<compile_context>
chip_gen: v6e
topology: v6e:2x2x1
jax: 0.10.0
libtpu: 0.0.40
codegen_flags: <defaults>
</compile_context>

<pallas_src>
import jax
import jax.numpy as jnp
from jax.experimental import pallas as pl
from jax.experimental.pallas import tpu as pltpu


def iris_mlp_kernel(x_ref, w1_ref, b1_ref, w2_ref, b2_ref, o_ref):
    # x_ref : VMEM [4, S, 128]  (feature, sublane-tiles, lanes) -- dense slabs
    # w1_ref: SMEM [8, 4]       (PyTorch hidden.weight layout)
    # b1_ref: SMEM [8]
    # w2_ref: SMEM [3, 8]       (PyTorch output.weight layout)
    # b2_ref: SMEM [3]
    # o_ref : VMEM [3, S, 128]
    x_rows = [x_ref[k] for k in range(4)]                 # each (S, 128), dense

    # Hidden layer: h[j] = relu(b1[j] + sum_k w1[j,k] * x[k])   (8 x 4 FMAs)
    h_rows = []
    for j in range(8):
        acc = x_rows[0] * w1_ref[j, 0]
        for k in range(1, 4):
            acc = acc + x_rows[k] * w1_ref[j, k]
        h_rows.append(jnp.maximum(acc + b1_ref[j], 0.0))  # ReLU, (S, 128)

    # Output layer: y[i] = b2[i] + sum_j w2[i,j] * h[j]         (3 x 8 FMAs)
    for i in range(3):
        acc = h_rows[0] * w2_ref[i, 0]
        for j in range(1, 8):
            acc = acc + h_rows[j] * w2_ref[i, j]
        o_ref[i] = acc + b2_ref[i]                        # dense (S,128) store


def _round_up(a, m):
    return (a + m - 1) // m * m


def _cdiv(a, m):
    return (a + m - 1) // m


def _choose_tile(bp, tile_b):
    """Pick batch tile TB (lanes*sublanes) and padded batch Bp2.

    bp is already a multiple of 128.  TB is either the full (small) batch or a
    multiple of 1024 (so TB//128 is a multiple of 8), sized to give >=2-4 grid
    steps for large batches (feeds both v7x TensorCores, overlaps DMA).
    """
    if bp <= 2048:
        return bp, bp                                   # single full-extent block
    tb = min(tile_b, max(1024, _round_up(_cdiv(bp, 4), 1024)))
    return tb, _round_up(bp, tb)


def iris_forward_feature_major(x_fm, w1, b1, w2, b2, *, tile_b=65536):
    """Pallas forward pass, feature-major API.

    x_fm: [4, B] float32  ->  returns [3, B] float32 (logits, feature-major).
    w1: [8, 4], b1: [8], w2: [3, 8], b2: [3]  (PyTorch nn.Linear conventions)
    """
    assert x_fm.shape[0] == 4
    B = x_fm.shape[1]

    # Validate tile: multiple of 1024 (=> sublane dim multiple of 8), >= 1024.
    tile_b = max(1024, (int(tile_b) // 1024) * 1024)

    bp = _round_up(max(B, 128), 128)
    TB, Bp = _choose_tile(bp, tile_b)
    S = TB // 128

    if Bp != B:
        x_fm = jnp.pad(x_fm, ((0, 0), (0, Bp - B)))
    x3 = x_fm.reshape(4, Bp // 128, 128)                  # free-ish: row-major reshape

    grid = (Bp // TB,)

    out3 = pl.pallas_call(
        iris_mlp_kernel,
        out_shape=jax.ShapeDtypeStruct((3, Bp // 128, 128), jnp.float32),
        grid=grid,
        in_specs=[
            # x: tiled along the (sublane-tile) batch axis; lanes always dense.
            pl.BlockSpec((4, S, 128), lambda i: (0, i, 0)),
            # Tiny params: whole arrays in SMEM, read as scalars in the kernel.
            pl.BlockSpec(memory_space=pltpu.MemorySpace.SMEM),
            pl.BlockSpec(memory_space=pltpu.MemorySpace.SMEM),
            pl.BlockSpec(memory_space=pltpu.MemorySpace.SMEM),
            pl.BlockSpec(memory_space=pltpu.MemorySpace.SMEM),
        ],
        out_specs=pl.BlockSpec((3, S, 128), lambda i: (0, i, 0)),
        compiler_params=pltpu.CompilerParams(
            dimension_semantics=("parallel",)),            # megacore split on v7x
    )(x3, w1, b1, w2, b2)

    out = out3.reshape(3, Bp)
    return out[:, :B] if Bp != B else out


def iris_forward(x, w1, b1, w2, b2, *, tile_b=65536, min_pallas_batch=2048):
    """Batch-major forward pass (PyTorch-style): x [B, 4] -> [B, 3].

    For small batches (B < min_pallas_batch) a fused XLA path is used: the
    transpose/pad/launch overhead of the Pallas path dwarfs the ~17 KFLOPs of
    real Iris-sized work.  Set min_pallas_batch=0 to force the Pallas kernel.
    """
    B = x.shape[0]
    if B < min_pallas_batch:
        return jnp.maximum(x @ w1.T + b1, 0.0) @ w2.T + b2
    return iris_forward_feature_major(x.T, w1, b1, w2, b2, tile_b=tile_b).T


def init_params(key):
    """Deterministic init mimicking nn.Linear default (uniform +/- 1/sqrt(fan_in))."""
    k1, k2, k3, k4 = jax.random.split(key, 4)
    bound1 = 1.0 / jnp.sqrt(4.0)
    bound2 = 1.0 / jnp.sqrt(8.0)
    w1 = jax.random.uniform(k1, (8, 4), jnp.float32, -bound1, bound1)  # hidden.weight
    b1 = jax.random.uniform(k2, (8,), jnp.float32, -bound1, bound1)    # hidden.bias
    w2 = jax.random.uniform(k3, (3, 8), jnp.float32, -bound2, bound2)  # output.weight
    b2 = jax.random.uniform(k4, (3,), jnp.float32, -bound2, bound2)    # output.bias
    return w1, b1, w2, b2


def _reference(x, w1, b1, w2, b2):
    return jnp.maximum(x @ w1.T + b1, 0.0) @ w2.T + b2


if __name__ == "__main__":
    key = jax.random.PRNGKey(0)
    kx1, kx2, kx3, kp = jax.random.split(key, 4)
    w1, b1, w2, b2 = init_params(kp)

    # 1) Tiny iris-like batch through the Pallas kernel (forced), single tile.
    x = jax.random.normal(kx1, (8, 4), jnp.float32)        # iris: 4 features
    out = jax.block_until_ready(
        iris_forward(x, w1, b1, w2, b2, min_pallas_batch=0))
    assert out.shape == (8, 3)
    assert jnp.allclose(out, _reference(x, w1, b1, w2, b2), atol=1e-5, rtol=1e-5)

    # 2) Ragged Iris-sized batch through the Pallas kernel (pad + slice path).
    x2 = jax.random.normal(kx2, (300, 4), jnp.float32)
    out2 = jax.block_until_ready(
        iris_forward(x2, w1, b1, w2, b2, min_pallas_batch=0))
    assert out2.shape == (300, 3)
    assert jnp.allclose(out2, _reference(x2, w1, b1, w2, b2), atol=1e-5, rtol=1e-5)

    # 3) Multi-tile grid (3 steps of TB=1024) via the transpose-free
    #    feature-major API; exercises the double-buffered pipeline.
    x3_fm = jax.random.normal(kx3, (4, 2304), jnp.float32)   # feature-major [4, B]
    out3 = jax.block_until_ready(
        iris_forward_feature_major(x3_fm, w1, b1, w2, b2, tile_b=1024))
    assert out3.shape == (3, 2304)
    ref3 = _reference(x3_fm.T, w1, b1, w2, b2).T
    assert jnp.allclose(out3, ref3, atol=1e-5, rtol=1e-5)

    # 4) Small-batch fast path (pure XLA, no Pallas launch).
    out4 = jax.block_until_ready(iris_forward(x2, w1, b1, w2, b2))
    assert jnp.allclose(out4, _reference(x2, w1, b1, w2, b2), atol=1e-5, rtol=1e-5)

    print("KERNEL_OK")
</pallas_src>

<mosaic_0001>
module attributes {stable_mosaic.version = 11 : i64} {
  func.func @iris_mlp_kernel(%arg0: i32, %arg1: memref<4x1x128xf32, #tpu.memory_space<vmem>>, %arg2: memref<8x4xf32, #tpu.memory_space<smem>>, %arg3: memref<8xf32, #tpu.memory_space<smem>>, %arg4: memref<3x8xf32, #tpu.memory_space<smem>>, %arg5: memref<3xf32, #tpu.memory_space<smem>>, %arg6: memref<3x1x128xf32, #tpu.memory_space<vmem>>) attributes {dimension_semantics = [#tpu.dimension_semantics<parallel>], iteration_bounds = array<i64: 1>, scalar_prefetch = 0 : i64, scratch_operands = 0 : i64, tpu.core_type = #tpu.core_type<tc>, window_params = [{transform_indices = @transform_0, window_bounds = array<i64: 4, 1, 128>}, {transform_indices = @transform_1, window_bounds = array<i64: 8, 4>}, {transform_indices = @transform_2, window_bounds = array<i64: 8>}, {transform_indices = @transform_3, window_bounds = array<i64: 3, 8>}, {transform_indices = @transform_4, window_bounds = array<i64: 3>}, {transform_indices = @transform_5, window_bounds = array<i64: 3, 1, 128>}]} {
    %c0 = arith.constant 0 : index
    %c0_0 = arith.constant 0 : index
    %c0_1 = arith.constant 0 : index
    %0 = vector.load %arg1[%c0, %c0_0, %c0_1] : memref<4x1x128xf32, #tpu.memory_space<vmem>>, vector<1x1x128xf32>
    %1 = vector.shape_cast %0 : vector<1x1x128xf32> to vector<1x128xf32>
    %c1 = arith.constant 1 : index
    %c0_2 = arith.constant 0 : index
    %c0_3 = arith.constant 0 : index
    %2 = vector.load %arg1[%c1, %c0_2, %c0_3] : memref<4x1x128xf32, #tpu.memory_space<vmem>>, vector<1x1x128xf32>
    %3 = vector.shape_cast %2 : vector<1x1x128xf32> to vector<1x128xf32>
    %c2 = arith.constant 2 : index
    %c0_4 = arith.constant 0 : index
    %c0_5 = arith.constant 0 : index
    %4 = vector.load %arg1[%c2, %c0_4, %c0_5] : memref<4x1x128xf32, #tpu.memory_space<vmem>>, vector<1x1x128xf32>
    %5 = vector.shape_cast %4 : vector<1x1x128xf32> to vector<1x128xf32>
    %c3 = arith.constant 3 : index
    %c0_6 = arith.constant 0 : index
    %c0_7 = arith.constant 0 : index
    %6 = vector.load %arg1[%c3, %c0_6, %c0_7] : memref<4x1x128xf32, #tpu.memory_space<vmem>>, vector<1x1x128xf32>
    %7 = vector.shape_cast %6 : vector<1x1x128xf32> to vector<1x128xf32>
    %c0_8 = arith.constant 0 : index
    %c0_9 = arith.constant 0 : index
    %8 = memref.load %arg2[%c0_8, %c0_9] : memref<8x4xf32, #tpu.memory_space<smem>>
    %9 = vector.broadcast %8 : f32 to vector<1x128xf32>
    %10 = arith.mulf %1, %9 : vector<1x128xf32>
    %c0_10 = arith.constant 0 : index
    %c1_11 = arith.constant 1 : index
    %11 = memref.load %arg2[%c0_10, %c1_11] : memref<8x4xf32, #tpu.memory_space<smem>>
    %12 = vector.broadcast %11 : f32 to vector<1x128xf32>
    %13 = arith.mulf %3, %12 : vector<1x128xf32>
    %14 = arith.addf %10, %13 : vector<1x128xf32>
    %c0_12 = arith.constant 0 : index
    %c2_13 = arith.constant 2 : index
    %15 = memref.load %arg2[%c0_12, %c2_13] : memref<8x4xf32, #tpu.memory_space<smem>>
    %16 = vector.broadcast %15 : f32 to vector<1x128xf32>
    %17 = arith.mulf %5, %16 : vector<1x128xf32>
    %18 = arith.addf %14, %17 : vector<1x128xf32>
    %c0_14 = arith.constant 0 : index
    %c3_15 = arith.constant 3 : index
    %19 = memref.load %arg2[%c0_14, %c3_15] : memref<8x4xf32, #tpu.memory_space<smem>>
    %20 = vector.broadcast %19 : f32 to vector<1x128xf32>
    %21 = arith.mulf %7, %20 : vector<1x128xf32>
    %22 = arith.addf %18, %21 : vector<1x128xf32>
    %c0_16 = arith.constant 0 : index
    %23 = memref.load %arg3[%c0_16] : memref<8xf32, #tpu.memory_space<smem>>
    %24 = vector.broadcast %23 : f32 to vector<1x128xf32>
    %25 = arith.addf %22, %24 : vector<1x128xf32>
    %cst = arith.constant 0.000000e+00 : f32
    %26 = vector.broadcast %cst : f32 to vector<1x128xf32>
    %27 = arith.maximumf %25, %26 : vector<1x128xf32>
    %c1_17 = arith.constant 1 : index
    %c0_18 = arith.constant 0 : index
    %28 = memref.load %arg2[%c1_17, %c0_18] : memref<8x4xf32, #tpu.memory_space<smem>>
    %29 = vector.broadcast %28 : f32 to vector<1x128xf32>
    %30 = arith.mulf %1, %29 : vector<1x128xf32>
    %c1_19 = arith.constant 1 : index
    %c1_20 = arith.constant 1 : index
    %31 = memref.load %arg2[%c1_19, %c1_20] : memref<8x4xf32, #tpu.memory_space<smem>>
    %32 = vector.broadcast %31 : f32 to vector<1x128xf32>
    %33 = arith.mulf %3, %32 : vector<1x128xf32>
    %34 = arith.addf %30, %33 : vector<1x128xf32>
    %c1_21 = arith.constant 1 : index
    %c2_22 = arith.constant 2 : index
    %35 = memref.load %arg2[%c1_21, %c2_22] : memref<8x4xf32, #tpu.memory_space<smem>>
    %36 = vector.broadcast %35 : f32 to vector<1x128xf32>
    %37 = arith.mulf %5, %36 : vector<1x128xf32>
    %38 = arith.addf %34, %37 : vector<1x128xf32>
    %c1_23 = arith.constant 1 : index
    %c3_24 = arith.constant 3 : index
    %39 = memref.load %arg2[%c1_23, %c3_24] : memref<8x4xf32, #tpu.memory_space<smem>>
    %40 = vector.broadcast %39 : f32 to vector<1x128xf32>
    %41 = arith.mulf %7, %40 : vector<1x128xf32>
    %42 = arith.addf %38, %41 : vector<1x128xf32>
    %c1_25 = arith.constant 1 : index
    %43 = memref.load %arg3[%c1_25] : memref<8xf32, #tpu.memory_space<smem>>
    %44 = vector.broadcast %43 : f32 to vector<1x128xf32>
    %45 = arith.addf %42, %44 : vector<1x128xf32>
    %cst_26 = arith.constant 0.000000e+00 : f32
    %46 = vector.broadcast %cst_26 : f32 to vector<1x128xf32>
    %47 = arith.maximumf %45, %46 : vector<1x128xf32>
    %c2_27 = arith.constant 2 : index
    %c0_28 = arith.constant 0 : index
    %48 = memref.load %arg2[%c2_27, %c0_28] : memref<8x4xf32, #tpu.memory_space<smem>>
    %49 = vector.broadcast %48 : f32 to vector<1x128xf32>
    %50 = arith.mulf %1, %49 : vector<1x128xf32>
    %c2_29 = arith.constant 2 : index
    %c1_30 = arith.constant 1 : index
    %51 = memref.load %arg2[%c2_29, %c1_30] : memref<8x4xf32, #tpu.memory_space<smem>>
    %52 = vector.broadcast %51 : f32 to vector<1x128xf32>
    %53 = arith.mulf %3, %52 : vector<1x128xf32>
    %54 = arith.addf %50, %53 : vector<1x128xf32>
    %c2_31 = arith.constant 2 : index
    %c2_32 = arith.constant 2 : index
    %55 = memref.load %arg2[%c2_31, %c2_32] : memref<8x4xf32, #tpu.memory_space<smem>>
    %56 = vector.broadcast %55 : f32 to vector<1x128xf32>
    %57 = arith.mulf %5, %56 : vector<1x128xf32>
    %58 = arith.addf %54, %57 : vector<1x128xf32>
    %c2_33 = arith.constant 2 : index
    %c3_34 = arith.constant 3 : index
    %59 = memref.load %arg2[%c2_33, %c3_34] : memref<8x4xf32, #tpu.memory_space<smem>>
    %60 = vector.broadcast %59 : f32 to vector<1x128xf32>
    %61 = arith.mulf %7, %60 : vector<1x128xf32>
    %62 = arith.addf %58, %61 : vector<1x128xf32>
    %c2_35 = arith.constant 2 : index
    %63 = memref.load %arg3[%c2_35] : memref<8xf32, #tpu.memory_space<smem>>
    %64 = vector.broadcast %63 : f32 to vector<1x128xf32>
    %65 = arith.addf %62, %64 : vector<1x128xf32>
    %cst_36 = arith.constant 0.000000e+00 : f32
    %66 = vector.broadcast %cst_36 : f32 to vector<1x128xf32>
    %67 = arith.maximumf %65, %66 : vector<1x128xf32>
    %c3_37 = arith.constant 3 : index
    %c0_38 = arith.constant 0 : index
    %68 = memref.load %arg2[%c3_37, %c0_38] : memref<8x4xf32, #tpu.memory_space<smem>>
    %69 = vector.broadcast %68 : f32 to vector<1x128xf32>
    %70 = arith.mulf %1, %69 : vector<1x128xf32>
    %c3_39 = arith.constant 3 : index
    %c1_40 = arith.constant 1 : index
    %71 = memref.load %arg2[%c3_39, %c1_40] : memref<8x4xf32, #tpu.memory_space<smem>>
    %72 = vector.broadcast %71 : f32 to vector<1x128xf32>
    %73 = arith.mulf %3, %72 : vector<1x128xf32>
    %74 = arith.addf %70, %73 : vector<1x128xf32>
    %c3_41 = arith.constant 3 : index
    %c2_42 = arith.constant 2 : index
    %75 = memref.load %arg2[%c3_41, %c2_42] : memref<8x4xf32, #tpu.memory_space<smem>>
    %76 = vector.broadcast %75 : f32 to vector<1x128xf32>
    %77 = arith.mulf %5, %76 : vector<1x128xf32>
    %78 = arith.addf %74, %77 : vector<1x128xf32>
    %c3_43 = arith.constant 3 : index
    %c3_44 = arith.constant 3 : index
    %79 = memref.load %arg2[%c3_43, %c3_44] : memref<8x4xf32, #tpu.memory_space<smem>>
    %80 = vector.broadcast %79 : f32 to vector<1x128xf32>
    %81 = arith.mulf %7, %80 : vector<1x128xf32>
    %82 = arith.addf %78, %81 : vector<1x128xf32>
    %c3_45 = arith.constant 3 : index
    %83 = memref.load %arg3[%c3_45] : memref<8xf32, #tpu.memory_space<smem>>
    %84 = vector.broadcast %83 : f32 to vector<1x128xf32>
    %85 = arith.addf %82, %84 : vector<1x128xf32>
    %cst_46 = arith.constant 0.000000e+00 : f32
    %86 = vector.broadcast %cst_46 : f32 to vector<1x128xf32>
    %87 = arith.maximumf %85, %86 : vector<1x128xf32>
    %c4 = arith.constant 4 : index
    %c0_47 = arith.constant 0 : index
    %88 = memref.load %arg2[%c4, %c0_47] : memref<8x4xf32, #tpu.memory_space<smem>>
    %89 = vector.broadcast %88 : f32 to vector<1x128xf32>
    %90 = arith.mulf %1, %89 : vector<1x128xf32>
    %c4_48 = arith.constant 4 : index
    %c1_49 = arith.constant 1 : index
    %91 = memref.load %arg2[%c4_48, %c1_49] : memref<8x4xf32, #tpu.memory_space<smem>>
    %92 = vector.broadcast %91 : f32 to vector<1x128xf32>
    %93 = arith.mulf %3, %92 : vector<1x128xf32>
    %94 = arith.addf %90, %93 : vector<1x128xf32>
    %c4_50 = arith.constant 4 : index
    %c2_51 = arith.constant 2 : index
    %95 = memref.load %arg2[%c4_50, %c2_51] : memref<8x4xf32, #tpu.memory_space<smem>>
    %96 = vector.broadcast %95 : f32 to vector<1x128xf32>
    %97 = arith.mulf %5, %96 : vector<1x128xf32>
    %98 = arith.addf %94, %97 : vector<1x128xf32>
    %c4_52 = arith.constant 4 : index
    %c3_53 = arith.constant 3 : index
    %99 = memref.load %arg2[%c4_52, %c3_53] : memref<8x4xf32, #tpu.memory_space<smem>>
    %100 = vector.broadcast %99 : f32 to vector<1x128xf32>
    %101 = arith.mulf %7, %100 : vector<1x128xf32>
    %102 = arith.addf %98, %101 : vector<1x128xf32>
    %c4_54 = arith.constant 4 : index
    %103 = memref.load %arg3[%c4_54] : memref<8xf32, #tpu.memory_space<smem>>
    %104 = vector.broadcast %103 : f32 to vector<1x128xf32>
    %105 = arith.addf %102, %104 : vector<1x128xf32>
    %cst_55 = arith.constant 0.000000e+00 : f32
    %106 = vector.broadcast %cst_55 : f32 to vector<1x128xf32>
    %107 = arith.maximumf %105, %106 : vector<1x128xf32>
    %c5 = arith.constant 5 : index
    %c0_56 = arith.constant 0 : index
    %108 = memref.load %arg2[%c5, %c0_56] : memref<8x4xf32, #tpu.memory_space<smem>>
    %109 = vector.broadcast %108 : f32 to vector<1x128xf32>
    %110 = arith.mulf %1, %109 : vector<1x128xf32>
    %c5_57 = arith.constant 5 : index
    %c1_58 = arith.constant 1 : index
    %111 = memref.load %arg2[%c5_57, %c1_58] : memref<8x4xf32, #tpu.memory_space<smem>>
    %112 = vector.broadcast %111 : f32 to vector<1x128xf32>
    %113 = arith.mulf %3, %112 : vector<1x128xf32>
    %114 = arith.addf %110, %113 : vector<1x128xf32>
    %c5_59 = arith.constant 5 : index
    %c2_60 = arith.constant 2 : index
    %115 = memref.load %arg2[%c5_59, %c2_60] : memref<8x4xf32, #tpu.memory_space<smem>>
    %116 = vector.broadcast %115 : f32 to vector<1x128xf32>
    %117 = arith.mulf %5, %116 : vector<1x128xf32>
    %118 = arith.addf %114, %117 : vector<1x128xf32>
    %c5_61 = arith.constant 5 : index
    %c3_62 = arith.constant 3 : index
    %119 = memref.load %arg2[%c5_61, %c3_62] : memref<8x4xf32, #tpu.memory_space<smem>>
    %120 = vector.broadcast %119 : f32 to vector<1x128xf32>
    %121 = arith.mulf %7, %120 : vector<1x128xf32>
    %122 = arith.addf %118, %121 : vector<1x128xf32>
    %c5_63 = arith.constant 5 : index
    %123 = memref.load %arg3[%c5_63] : memref<8xf32, #tpu.memory_space<smem>>
    %124 = vector.broadcast %123 : f32 to vector<1x128xf32>
    %125 = arith.addf %122, %124 : vector<1x128xf32>
    %cst_64 = arith.constant 0.000000e+00 : f32
    %126 = vector.broadcast %cst_64 : f32 to vector<1x128xf32>
    %127 = arith.maximumf %125, %126 : vector<1x128xf32>
    %c6 = arith.constant 6 : index
    %c0_65 = arith.constant 0 : index
    %128 = memref.load %arg2[%c6, %c0_65] : memref<8x4xf32, #tpu.memory_space<smem>>
    %129 = vector.broadcast %128 : f32 to vector<1x128xf32>
    %130 = arith.mulf %1, %129 : vector<1x128xf32>
    %c6_66 = arith.constant 6 : index
    %c1_67 = arith.constant 1 : index
    %131 = memref.load %arg2[%c6_66, %c1_67] : memref<8x4xf32, #tpu.memory_space<smem>>
    %132 = vector.broadcast %131 : f32 to vector<1x128xf32>
    %133 = arith.mulf %3, %132 : vector<1x128xf32>
    %134 = arith.addf %130, %133 : vector<1x128xf32>
    %c6_68 = arith.constant 6 : index
    %c2_69 = arith.constant 2 : index
    %135 = memref.load %arg2[%c6_68, %c2_69] : memref<8x4xf32, #tpu.memory_space<smem>>
    %136 = vector.broadcast %135 : f32 to vector<1x128xf32>
    %137 = arith.mulf %5, %136 : vector<1x128xf32>
    %138 = arith.addf %134, %137 : vector<1x128xf32>
    %c6_70 = arith.constant 6 : index
    %c3_71 = arith.constant 3 : index
    %139 = memref.load %arg2[%c6_70, %c3_71] : memref<8x4xf32, #tpu.memory_space<smem>>
    %140 = vector.broadcast %139 : f32 to vector<1x128xf32>
    %141 = arith.mulf %7, %140 : vector<1x128xf32>
    %142 = arith.addf %138, %141 : vector<1x128xf32>
    %c6_72 = arith.constant 6 : index
    %143 = memref.load %arg3[%c6_72] : memref<8xf32, #tpu.memory_space<smem>>
    %144 = vector.broadcast %143 : f32 to vector<1x128xf32>
    %145 = arith.addf %142, %144 : vector<1x128xf32>
    %cst_73 = arith.constant 0.000000e+00 : f32
    %146 = vector.broadcast %cst_73 : f32 to vector<1x128xf32>
    %147 = arith.maximumf %145, %146 : vector<1x128xf32>
    %c7 = arith.constant 7 : index
    %c0_74 = arith.constant 0 : index
    %148 = memref.load %arg2[%c7, %c0_74] : memref<8x4xf32, #tpu.memory_space<smem>>
    %149 = vector.broadcast %148 : f32 to vector<1x128xf32>
    %150 = arith.mulf %1, %149 : vector<1x128xf32>
    %c7_75 = arith.constant 7 : index
    %c1_76 = arith.constant 1 : index
    %151 = memref.load %arg2[%c7_75, %c1_76] : memref<8x4xf32, #tpu.memory_space<smem>>
    %152 = vector.broadcast %151 : f32 to vector<1x128xf32>
    %153 = arith.mulf %3, %152 : vector<1x128xf32>
    %154 = arith.addf %150, %153 : vector<1x128xf32>
    %c7_77 = arith.constant 7 : index
    %c2_78 = arith.constant 2 : index
    %155 = memref.load %arg2[%c7_77, %c2_78] : memref<8x4xf32, #tpu.memory_space<smem>>
    %156 = vector.broadcast %155 : f32 to vector<1x128xf32>
    %157 = arith.mulf %5, %156 : vector<1x128xf32>
    %158 = arith.addf %154, %157 : vector<1x128xf32>
    %c7_79 = arith.constant 7 : index
    %c3_80 = arith.constant 3 : index
    %159 = memref.load %arg2[%c7_79, %c3_80] : memref<8x4xf32, #tpu.memory_space<smem>>
    %160 = vector.broadcast %159 : f32 to vector<1x128xf32>
    %161 = arith.mulf %7, %160 : vector<1x128xf32>
    %162 = arith.addf %158, %161 : vector<1x128xf32>
    %c7_81 = arith.constant 7 : index
    %163 = memref.load %arg3[%c7_81] : memref<8xf32, #tpu.memory_space<smem>>
    %164 = vector.broadcast %163 : f32 to vector<1x128xf32>
    %165 = arith.addf %162, %164 : vector<1x128xf32>
    %cst_82 = arith.constant 0.000000e+00 : f32
    %166 = vector.broadcast %cst_82 : f32 to vector<1x128xf32>
    %167 = arith.maximumf %165, %166 : vector<1x128xf32>
    %c0_83 = arith.constant 0 : index
    %c0_84 = arith.constant 0 : index
    %168 = memref.load %arg4[%c0_83, %c0_84] : memref<3x8xf32, #tpu.memory_space<smem>>
    %169 = vector.broadcast %168 : f32 to vector<1x128xf32>
    %170 = arith.mulf %27, %169 : vector<1x128xf32>
    %c0_85 = arith.constant 0 : index
    %c1_86 = arith.constant 1 : index
    %171 = memref.load %arg4[%c0_85, %c1_86] : memref<3x8xf32, #tpu.memory_space<smem>>
    %172 = vector.broadcast %171 : f32 to vector<1x128xf32>
    %173 = arith.mulf %47, %172 : vector<1x128xf32>
    %174 = arith.addf %170, %173 : vector<1x128xf32>
    %c0_87 = arith.constant 0 : index
    %c2_88 = arith.constant 2 : index
    %175 = memref.load %arg4[%c0_87, %c2_88] : memref<3x8xf32, #tpu.memory_space<smem>>
    %176 = vector.broadcast %175 : f32 to vector<1x128xf32>
    %177 = arith.mulf %67, %176 : vector<1x128xf32>
    %178 = arith.addf %174, %177 : vector<1x128xf32>
    %c0_89 = arith.constant 0 : index
    %c3_90 = arith.constant 3 : index
    %179 = memref.load %arg4[%c0_89, %c3_90] : memref<3x8xf32, #tpu.memory_space<smem>>
    %180 = vector.broadcast %179 : f32 to vector<1x128xf32>
    %181 = arith.mulf %87, %180 : vector<1x128xf32>
    %182 = arith.addf %178, %181 : vector<1x128xf32>
    %c0_91 = arith.constant 0 : index
    %c4_92 = arith.constant 4 : index
    %183 = memref.load %arg4[%c0_91, %c4_92] : memref<3x8xf32, #tpu.memory_space<smem>>
    %184 = vector.broadcast %183 : f32 to vector<1x128xf32>
    %185 = arith.mulf %107, %184 : vector<1x128xf32>
    %186 = arith.addf %182, %185 : vector<1x128xf32>
    %c0_93 = arith.constant 0 : index
    %c5_94 = arith.constant 5 : index
    %187 = memref.load %arg4[%c0_93, %c5_94] : memref<3x8xf32, #tpu.memory_space<smem>>
    %188 = vector.broadcast %187 : f32 to vector<1x128xf32>
    %189 = arith.mulf %127, %188 : vector<1x128xf32>
    %190 = arith.addf %186, %189 : vector<1x128xf32>
    %c0_95 = arith.constant 0 : index
    %c6_96 = arith.constant 6 : index
    %191 = memref.load %arg4[%c0_95, %c6_96] : memref<3x8xf32, #tpu.memory_space<smem>>
    %192 = vector.broadcast %191 : f32 to vector<1x128xf32>
    %193 = arith.mulf %147, %192 : vector<1x128xf32>
    %194 = arith.addf %190, %193 : vector<1x128xf32>
    %c0_97 = arith.constant 0 : index
    %c7_98 = arith.constant 7 : index
    %195 = memref.load %arg4[%c0_97, %c7_98] : memref<3x8xf32, #tpu.memory_space<smem>>
    %196 = vector.broadcast %195 : f32 to vector<1x128xf32>
    %197 = arith.mulf %167, %196 : vector<1x128xf32>
    %198 = arith.addf %194, %197 : vector<1x128xf32>
    %c0_99 = arith.constant 0 : index
    %199 = memref.load %arg5[%c0_99] : memref<3xf32, #tpu.memory_space<smem>>
    %200 = vector.broadcast %199 : f32 to vector<1x128xf32>
    %201 = arith.addf %198, %200 : vector<1x128xf32>
    %c0_100 = arith.constant 0 : index
    %c0_101 = arith.constant 0 : index
    %c0_102 = arith.constant 0 : index
    %202 = vector.load %arg6[%c0_100, %c0_101, %c0_102] : memref<3x1x128xf32, #tpu.memory_space<vmem>>, vector<1x1x128xf32>
    %203 = vector.shape_cast %202 : vector<1x1x128xf32> to vector<1x128xf32>
    %204 = vector.shape_cast %201 : vector<1x128xf32> to vector<1x1x128xf32>
    tpu.vector_store %arg6[%c0_100, %c0_101, %c0_102], %204 {strides = array<i32>} : memref<3x1x128xf32, #tpu.memory_space<vmem>>, vector<1x1x128xf32>,
    %c1_103 = arith.constant 1 : index
    %c0_104 = arith.constant 0 : index
    %205 = memref.load %arg4[%c1_103, %c0_104] : memref<3x8xf32, #tpu.memory_space<smem>>
    %206 = vector.broadcast %205 : f32 to vector<1x128xf32>
    %207 = arith.mulf %27, %206 : vector<1x128xf32>
    %c1_105 = arith.constant 1 : index
    %c1_106 = arith.constant 1 : index
    %208 = memref.load %arg4[%c1_105, %c1_106] : memref<3x8xf32, #tpu.memory_space<smem>>
    %209 = vector.broadcast %208 : f32 to vector<1x128xf32>
    %210 = arith.mulf %47, %209 : vector<1x128xf32>
    %211 = arith.addf %207, %210 : vector<1x128xf32>
    %c1_107 = arith.constant 1 : index
    %c2_108 = arith.constant 2 : index
    %212 = memref.load %arg4[%c1_107, %c2_108] : memref<3x8xf32, #tpu.memory_space<smem>>
    %213 = vector.broadcast %212 : f32 to vector<1x128xf32>
    %214 = arith.mulf %67, %213 : vector<1x128xf32>
    %215 = arith.addf %211, %214 : vector<1x128xf32>
    %c1_109 = arith.constant 1 : index
    %c3_110 = arith.constant 3 : index
    %216 = memref.load %arg4[%c1_109, %c3_110] : memref<3x8xf32, #tpu.memory_space<smem>>
    %217 = vector.broadcast %216 : f32 to vector<1x128xf32>
    %218 = arith.mulf %87, %217 : vector<1x128xf32>
    %219 = arith.addf %215, %218 : vector<1x128xf32>
    %c1_111 = arith.constant 1 : index
    %c4_112 = arith.constant 4 : index
    %220 = memref.load %arg4[%c1_111, %c4_112] : memref<3x8xf32, #tpu.memory_space<smem>>
    %221 = vector.broadcast %220 : f32 to vector<1x128xf32>
    %222 = arith.mulf %107, %221 : vector<1x128xf32>
    %223 = arith.addf %219, %222 : vector<1x128xf32>
    %c1_113 = arith.constant 1 : index
    %c5_114 = arith.constant 5 : index
    %224 = memref.load %arg4[%c1_113, %c5_114] : memref<3x8xf32, #tpu.memory_space<smem>>
    %225 = vector.broadcast %224 : f32 to vector<1x128xf32>
    %226 = arith.mulf %127, %225 : vector<1x128xf32>
    %227 = arith.addf %223, %226 : vector<1x128xf32>
    %c1_115 = arith.constant 1 : index
    %c6_116 = arith.constant 6 : index
    %228 = memref.load %arg4[%c1_115, %c6_116] : memref<3x8xf32, #tpu.memory_space<smem>>
    %229 = vector.broadcast %228 : f32 to vector<1x128xf32>
    %230 = arith.mulf %147, %229 : vector<1x128xf32>
    %231 = arith.addf %227, %230 : vector<1x128xf32>
    %c1_117 = arith.constant 1 : index
    %c7_118 = arith.constant 7 : index
    %232 = memref.load %arg4[%c1_117, %c7_118] : memref<3x8xf32, #tpu.memory_space<smem>>
    %233 = vector.broadcast %232 : f32 to vector<1x128xf32>
    %234 = arith.mulf %167, %233 : vector<1x128xf32>
    %235 = arith.addf %231, %234 : vector<1x128xf32>
    %c1_119 = arith.constant 1 : index
    %236 = memref.load %arg5[%c1_119] : memref<3xf32, #tpu.memory_space<smem>>
    %237 = vector.broadcast %236 : f32 to vector<1x128xf32>
    %238 = arith.addf %235, %237 : vector<1x128xf32>
    %c1_120 = arith.constant 1 : index
    %c0_121 = arith.constant 0 : index
    %c0_122 = arith.constant 0 : index
    %239 = vector.load %arg6[%c1_120, %c0_121, %c0_122] : memref<3x1x128xf32, #tpu.memory_space<vmem>>, vector<1x1x128xf32>
    %240 = vector.shape_cast %239 : vector<1x1x128xf32> to vector<1x128xf32>
    %241 = vector.shape_cast %238 : vector<1x128xf32> to vector<1x1x128xf32>
    tpu.vector_store %arg6[%c1_120, %c0_121, %c0_122], %241 {strides = array<i32>} : memref<3x1x128xf32, #tpu.memory_space<vmem>>, vector<1x1x128xf32>,
    %c2_123 = arith.constant 2 : index
    %c0_124 = arith.constant 0 : index
    %242 = memref.load %arg4[%c2_123, %c0_124] : memref<3x8xf32, #tpu.memory_space<smem>>
    %243 = vector.broadcast %242 : f32 to vector<1x128xf32>
    %244 = arith.mulf %27, %243 : vector<1x128xf32>
    %c2_125 = arith.constant 2 : index
    %c1_126 = arith.constant 1 : index
    %245 = memref.load %arg4[%c2_125, %c1_126] : memref<3x8xf32, #tpu.memory_space<smem>>
    %246 = vector.broadcast %245 : f32 to vector<1x128xf32>
    %247 = arith.mulf %47, %246 : vector<1x128xf32>
    %248 = arith.addf %244, %247 : vector<1x128xf32>
    %c2_127 = arith.constant 2 : index
    %c2_128 = arith.constant 2 : index
    %249 = memref.load %arg4[%c2_127, %c2_128] : memref<3x8xf32, #tpu.memory_space<smem>>
    %250 = vector.broadcast %249 : f32 to vector<1x128xf32>
    %251 = arith.mulf %67, %250 : vector<1x128xf32>
    %252 = arith.addf %248, %251 : vector<1x128xf32>
    %c2_129 = arith.constant 2 : index
    %c3_130 = arith.constant 3 : index
    %253 = memref.load %arg4[%c2_129, %c3_130] : memref<3x8xf32, #tpu.memory_space<smem>>
    %254 = vector.broadcast %253 : f32 to vector<1x128xf32>
    %255 = arith.mulf %87, %254 : vector<1x128xf32>
    %256 = arith.addf %252, %255 : vector<1x128xf32>
    %c2_131 = arith.constant 2 : index
    %c4_132 = arith.constant 4 : index
    %257 = memref.load %arg4[%c2_131, %c4_132] : memref<3x8xf32, #tpu.memory_space<smem>>
    %258 = vector.broadcast %257 : f32 to vector<1x128xf32>
    %259 = arith.mulf %107, %258 : vector<1x128xf32>
    %260 = arith.addf %256, %259 : vector<1x128xf32>
    %c2_133 = arith.constant 2 : index
    %c5_134 = arith.constant 5 : index
    %261 = memref.load %arg4[%c2_133, %c5_134] : memref<3x8xf32, #tpu.memory_space<smem>>
    %262 = vector.broadcast %261 : f32 to vector<1x128xf32>
    %263 = arith.mulf %127, %262 : vector<1x128xf32>
    %264 = arith.addf %260, %263 : vector<1x128xf32>
    %c2_135 = arith.constant 2 : index
    %c6_136 = arith.constant 6 : index
    %265 = memref.load %arg4[%c2_135, %c6_136] : memref<3x8xf32, #tpu.memory_space<smem>>
    %266 = vector.broadcast %265 : f32 to vector<1x128xf32>
    %267 = arith.mulf %147, %266 : vector<1x128xf32>
    %268 = arith.addf %264, %267 : vector<1x128xf32>
    %c2_137 = arith.constant 2 : index
    %c7_138 = arith.constant 7 : index
    %269 = memref.load %arg4[%c2_137, %c7_138] : memref<3x8xf32, #tpu.memory_space<smem>>
    %270 = vector.broadcast %269 : f32 to vector<1x128xf32>
    %271 = arith.mulf %167, %270 : vector<1x128xf32>
    %272 = arith.addf %268, %271 : vector<1x128xf32>
    %c2_139 = arith.constant 2 : index
    %273 = memref.load %arg5[%c2_139] : memref<3xf32, #tpu.memory_space<smem>>
    %274 = vector.broadcast %273 : f32 to vector<1x128xf32>
    %275 = arith.addf %272, %274 : vector<1x128xf32>
    %c2_140 = arith.constant 2 : index
    %c0_141 = arith.constant 0 : index
    %c0_142 = arith.constant 0 : index
    %276 = vector.load %arg6[%c2_140, %c0_141, %c0_142] : memref<3x1x128xf32, #tpu.memory_space<vmem>>, vector<1x1x128xf32>
    %277 = vector.shape_cast %276 : vector<1x1x128xf32> to vector<1x128xf32>
    %278 = vector.shape_cast %275 : vector<1x128xf32> to vector<1x1x128xf32>
    tpu.vector_store %arg6[%c2_140, %c0_141, %c0_142], %278 {strides = array<i32>} : memref<3x1x128xf32, #tpu.memory_space<vmem>>, vector<1x1x128xf32>,
    return
  }
  func.func @transform_0(%arg0: i32) -> (i32, i32, i32) {
    %c0_i32 = arith.constant 0 : i32
    %c0_i32_0 = arith.constant 0 : i32
    %c0_i32_1 = arith.constant 0 : i32
    return %c0_i32, %arg0, %c0_i32_0 : i32, i32, i32
  }
  func.func @transform_1(%arg0: i32) -> (i32, i32) {
    %c0_i32 = arith.constant 0 : i32
    %c0_i32_0 = arith.constant 0 : i32
    %c0_i32_1 = arith.constant 0 : i32
    return %c0_i32, %c0_i32_0 : i32, i32
  }
  func.func @transform_2(%arg0: i32) -> i32 {
    %c0_i32 = arith.constant 0 : i32
    %c0_i32_0 = arith.constant 0 : i32
    return %c0_i32 : i32
  }
  func.func @transform_3(%arg0: i32) -> (i32, i32) {
    %c0_i32 = arith.constant 0 : i32
    %c0_i32_0 = arith.constant 0 : i32
    %c0_i32_1 = arith.constant 0 : i32
    return %c0_i32, %c0_i32_0 : i32, i32
  }
  func.func @transform_4(%arg0: i32) -> i32 {
    %c0_i32 = arith.constant 0 : i32
    %c0_i32_0 = arith.constant 0 : i32
    return %c0_i32 : i32
  }
  func.func @transform_5(%arg0: i32) -> (i32, i32, i32) {
    %c0_i32 = arith.constant 0 : i32
    %c0_i32_0 = arith.constant 0 : i32
    %c0_i32_1 = arith.constant 0 : i32
    return %c0_i32, %arg0, %c0_i32_0 : i32, i32, i32
  }
}

</mosaic_0001>

<bundles_post_ra>
// kernel: tpu_custom_call.1
= control target key start
LH: loop header
LB: loop body
LE: loop exit
PB: predicated region body
PF: predicated region fallthrough
CT: control target
= control target key end

     0   :  { %10 = vsyncpa [#allocation4], 0  ;;  %s794_s0 = inlined_call_operand.vmem [shape: f32[4,1,128], index: 0, kind: input, shape index: {}]   ;;  %s795_s1 = inlined_call_operand.vmem [shape: f32[8,4], index: 1, kind: input, shape index: {}]   ;;  %s796_s2 = inlined_call_operand.vmem [shape: f32[8], index: 2, kind: input, shape index: {}]   ;;  %s797_s3 = inlined_call_operand.vmem [shape: f32[3,8], index: 3, kind: input, shape index: {}]   ;;  %s798_s4 = inlined_call_operand.vmem [shape: f32[3], index: 4, kind: input, shape index: {}]   ;;  %s799_s5 = inlined_call_operand.hbm [shape: f32[3,1,128], index: 5, kind: output, shape index: {}]  }
   0x1   :  { %11 = vsyncpa [#allocation6], 0 }
   0x2   :  { %12 = vsyncpa [#allocation9], 0  ;;  %s32_s20 = sshll.u32 %s796_s2, 4  ;;  %s33_s20 = int_to_ptr.vmem [resolvable:$true] %s32_s20 }
   0x3   :  { %13 = vsyncpa [#allocation3], 0  ;;  %s22_s23 = sshll.u32 %s795_s1, 4  ;;  %s427_s24 = scalar_lea.vmem %s33_s20, 16  ;;  %s23_s23 = int_to_ptr.vmem [resolvable:$true] %s22_s23 }
   0x4   :  { %p428_p0 = scmp.ne.s32.totalorder %s33_s20, %s427_s24  ;;  %p432_p1 = scmp.lt.s32.totalorder %s33_s20, %s33_s20 }
   0x5   :  { %p433_p2 = scmp.lt.s32.totalorder %s427_s24, %s427_s24 }
   0x7   :  { %p434_p3 = por %p433_p2, %p432_p1 }
   0x9   :  { %p435_p4 = pnand %p434_p3, %p428_p0 }
   0xb   :  { %438 = shalt.err (!%p435_p4)
}
   0xc   :  { %s503_s25 = smov [#allocation5]   ;;  %s439_s26 = scalar_lea.vmem %s23_s23, 128 }
   0xd   :  { %35 = dma.vmem_to_smem %s33_s20, 16, %s503_s25, [#allocation6]  }
   0xe   :  { %p440_p5 = scmp.ne.s32.totalorder %s23_s23, %s439_s26  ;;  %p444_p6 = scmp.lt.s32.totalorder %s23_s23, %s23_s23 }
   0xf   :  { %p445_p7 = scmp.lt.s32.totalorder %s439_s26, %s439_s26 }
  0x11   :  { %p446_p8 = por %p445_p7, %p444_p6 }
  0x13   :  { %p447_p9 = pnand %p446_p8, %p440_p5 }
  0x15   :  { %450 = shalt.err (!%p447_p9)
}
  0x16   :  { %s504_s2 = smov [#allocation2]   ;;  %s42_s28 = sshll.u32 %s797_s3, 4  ;;  %s43_s28 = int_to_ptr.vmem [resolvable:$true] %s42_s28 }
  0x17   :  { %25 = dma.vmem_to_smem %s23_s23, 128, %s504_s2, [#allocation4]  }
  0x18   :  { %s52_s6 = sshll.u32 %s798_s4, 4  ;;  %s451_s7 = scalar_lea.vmem %s43_s28, 64  ;;  %s53_s6 = int_to_ptr.vmem [resolvable:$true] %s52_s6 }
  0x19   :  { %p452_p10 = scmp.ne.s32.totalorder %s43_s28, %s451_s7  ;;  %p456_p11 = scmp.lt.s32.totalorder %s43_s28, %s43_s28 }
  0x1a   :  { %p457_p12 = scmp.lt.s32.totalorder %s451_s7, %s451_s7 }
  0x1c   :  { %p458_p13 = por %p457_p12, %p456_p11 }
  0x1e   :  { %p459_p0 = pnand %p458_p13, %p452_p10 }
  0x20   :  { %462 = shalt.err (!%p459_p0)
}
  0x21   :  { %s505_s8 = smov [#allocation7]   ;;  %s463_s9 = scalar_lea.vmem %s53_s6, 16 }
  0x22   :  { %45 = dma.vmem_to_smem %s43_s28, 64, %s505_s8, [#allocation6]  }
  0x23   :  { %p464_p1 = scmp.ne.s32.totalorder %s53_s6, %s463_s9  ;;  %p468_p2 = scmp.lt.s32.totalorder %s53_s6, %s53_s6 }
  0x24   :  { %p469_p3 = scmp.lt.s32.totalorder %s463_s9, %s463_s9 }
  0x26   :  { %p470_p4 = por %p469_p3, %p468_p2 }
  0x28   :  { %p471_p5 = pnand %p470_p4, %p464_p1 }
  0x2a   :  { %474 = shalt.err (!%p471_p5)
}
  0x2b   :  { %s506_s3 = smov [#allocation8]  }
  0x2c   :  { %55 = dma.vmem_to_smem %s53_s6, 16, %s506_s3, [#allocation9]  }
  0x2d   :  { %495 = dma.done.wait [#allocation4], 128  }
  0x2e   :  { %496 = vsyncadd [#allocation4], 4294967168 }
  0x2f   :  { %497 = dma.done.wait [#allocation6], 80  }
  0x30   :  { %498 = vsyncadd [#allocation6], 4294967216 }
  0x31   :  { %499 = dma.done.wait [#allocation9], 16  }
  0x32   :  { %500 = vsyncadd [#allocation9], 4294967280 }
  0x33   :  { %68 = sfence }
  0x34   :  { %s76_s4 = sld [smem:[#allocation2]]  ;;  %v577_v0 = vld [vmem:[%s794_s0] sm:$0x1]  ;;  %v582_v1 = vld [vmem:[%s794_s0 + $0x1] sm:$0x1] }
  0x35   :  { %s357_s10 = sld [smem:[#allocation2 + $0x1]]  ;;  %v593_v4 = vld [vmem:[%s794_s0 + $0x2] sm:$0x1]  ;;  %v614_v15 = vld [vmem:[%s794_s0 + $0x3] sm:$0x1] }
  0x36   :  { %s358_s11 = sld [smem:[#allocation2 + $0x2]] }
  0x37   :  { %s552_s12 = sld [smem:[#allocation2 + $0x3]] }
  0x38   :  { %s554_s13 = sld [smem:[#allocation5]] }
  0x39   :  { %s556_s14 = sld [smem:[#allocation2 + $0x80]] }
  0x3a   :  { %s558_s15 = sld [smem:[#allocation2 + $0x81]]  ;;  %v77_v2 = vstv %s76_s4 }
  0x3b   :  { %s560_s16 = sld [smem:[#allocation2 + $0x82]]  ;;  %v80_v3 = vstv %s357_s10  ;;  %v78_v5 = vmul.f32 %v77_v2, %v577_v0 }
  0x3c   :  { %s562_s17 = sld [smem:[#allocation2 + $0x83]]  ;;  %v81_v6 = vmul.f32 %v582_v1, %v80_v3  ;;  %v84_v7 = vstv %s358_s11 }
  0x3d   :  { %s564_s18 = sld [smem:[#allocation5 + $0x1]]  ;;  %v85_v10 = vmul.f32 %v593_v4, %v84_v7  ;;  %v88_v12 = vstv %s552_s12 }
  0x3e   :  { %s566_s19 = sld [smem:[#allocation2 + $0x100]]  ;;  %v82_v11 = vadd.f32 %v81_v6, %v78_v5  ;;  %v89_v25 = vmul.f32 %v614_v15, %v88_v12  ;;  %v92_v40 = vstv %s554_s13 }
  0x3f   :  { %s568_s20 = sld [smem:[#allocation2 + $0x101]]  ;;  %v96_v8 = vstv %s556_s14 }
  0x40   :  { %s570_s21 = sld [smem:[#allocation2 + $0x102]]  ;;  %v99_v9 = vstv %s558_s15  ;;  %v97_v16 = vmul.f32 %v96_v8, %v577_v0  ;;  %v86_v24 = vadd.f32 %v85_v10, %v82_v11 }
  0x41   :  { %s572_s22 = sld [smem:[#allocation2 + $0x103]]  ;;  %v100_v17 = vmul.f32 %v582_v1, %v99_v9  ;;  %v103_v20 = vstv %s560_s16 }
  0x42   :  { %s584_s2 = sld [smem:[#allocation5 + $0x2]]  ;;  %v104_v29 = vmul.f32 %v593_v4, %v103_v20  ;;  %v107_v32 = vstv %s562_s17  ;;  %v90_v43 = vadd.f32 %v89_v25, %v86_v24 }
  0x43   :  { %s586_s1 = sld [smem:[#allocation2 + $0x180]]  ;;  %v101_v28 = vadd.f32 %v100_v17, %v97_v16  ;;  %v108_v45 = vmul.f32 %v614_v15, %v107_v32  ;;  %v111_v60 = vstv %s564_s18 }
  0x44   :  { %s588_s27 = sld [smem:[#allocation2 + $0x181]]  ;;  %v115_v13 = vstv %s566_s19  ;;  %v93_v59 = vadd.f32 %v92_v40, %v90_v43 }
  0x45   :  { %s597_s30 = sld [smem:[#allocation2 + $0x182]]  ;;  %v118_v14 = vstv %s568_s20  ;;  %v116_v21 = vmul.f32 %v115_v13, %v577_v0  ;;  %v105_v44 = vadd.f32 %v104_v29, %v101_v28 }
  0x46   :  { %s599_s6 = sld [smem:[#allocation2 + $0x183]]  ;;  %v119_v22 = vmul.f32 %v582_v1, %v118_v14  ;;  %v122_v23 = vstv %s570_s21  ;;  %v703_v25 = vmax.f32 %v93_v59, 0.0 }
  0x47   :  { %s603_s7 = sld [smem:[#allocation5 + $0x3]]  ;;  %v123_v33 = vmul.f32 %v593_v4, %v122_v23  ;;  %v126_v37 = vstv %s572_s22  ;;  %v109_v5 = vadd.f32 %v108_v45, %v105_v44 }
  0x48   :  { %s375_s8 = sld [smem:[#allocation2 + $0x200]]  ;;  %v120_v36 = vadd.f32 %v119_v22, %v116_v21  ;;  %v127_v47 = vmul.f32 %v614_v15, %v126_v37  ;;  %v130_v7 = vstv %s584_s2 }
  0x49   :  { %s609_s9 = sld [smem:[#allocation2 + $0x201]]  ;;  %v134_v18 = vstv %s586_s1  ;;  %v112_v21 = vadd.f32 %v111_v60, %v109_v5 }
  0x4a   :  { %v137_v19 = vstv %s588_s27  ;;  %s620_s10 = sld [smem:[#allocation2 + $0x202]]  ;;  %v135_v26 = vmul.f32 %v134_v18, %v577_v0  ;;  %v124_v51 = vadd.f32 %v123_v33, %v120_v36 }
  0x4b   :  { %s623_s11 = sld [smem:[#allocation2 + $0x203]]  ;;  %v138_v27 = vmul.f32 %v582_v1, %v137_v19  ;;  %v141_v30 = vstv %s597_s30  ;;  %v717_v37 = vmax.f32 %v112_v21, 0.0 }
  0x4c   :  { %s628_s0 = sld [smem:[#allocation5 + $0x4]]  ;;  %v142_v42 = vmul.f32 %v593_v4, %v141_v30  ;;  %v145_v46 = vstv %s599_s6  ;;  %v128_v6 = vadd.f32 %v127_v47, %v124_v51 }
  0x4d   :  { %s633_s12 = sld [smem:[#allocation2 + $0x280]]  ;;  %v139_v41 = vadd.f32 %v138_v27, %v135_v26  ;;  %v146_v56 = vmul.f32 %v614_v15, %v145_v46  ;;  %v149_v10 = vstv %s603_s7 }
  0x4e   :  { %v153_v31 = vstv %s375_s8  ;;  %s637_s14 = sld [smem:[#allocation2 + $0x281]]  ;;  %v131_v26 = vadd.f32 %v130_v7, %v128_v6 }
  0x4f   :  { %v154_v34 = vmul.f32 %v153_v31, %v577_v0  ;;  %v156_v35 = vstv %s609_s9  ;;  %s643_s15 = sld [smem:[#allocation2 + $0x282]]  ;;  %v143_v55 = vadd.f32 %v142_v42, %v139_v41 }
  0x50   :  { %v157_v38 = vmul.f32 %v582_v1, %v156_v35  ;;  %v160_v39 = vstv %s620_s10  ;;  %s648_s16 = sld [smem:[#allocation2 + $0x283]] }
  0x51   :  { %s652_s17 = sld [smem:[#allocation5 + $0x5]]  ;;  %v161_v49 = vmul.f32 %v593_v4, %v160_v39  ;;  %v164_v52 = vstv %s623_s11  ;;  %v147_v9 = vadd.f32 %v146_v56, %v143_v55 }
  0x52   :  { %s656_s19 = sld [smem:[#allocation2 + $0x300]]  ;;  %v158_v48 = vadd.f32 %v157_v38, %v154_v34  ;;  %v165_v63 = vmul.f32 %v614_v15, %v164_v52  ;;  %v168_v22 = vstv %s628_s0 }
  0x53   :  { %v172_v50 = vstv %s633_s12  ;;  %s661_s13 = sld [smem:[#allocation2 + $0x301]]  ;;  %v150_v27 = vadd.f32 %v149_v10, %v147_v9 }
  0x54   :  { %v173_v53 = vmul.f32 %v172_v50, %v577_v0  ;;  %v175_v54 = vstv %s637_s14  ;;  %s666_s20 = sld [smem:[#allocation2 + $0x302]]  ;;  %v162_v62 = vadd.f32 %v161_v49, %v158_v48 }
  0x55   :  { %v176_v57 = vmul.f32 %v582_v1, %v175_v54  ;;  %v179_v58 = vstv %s643_s15  ;;  %s671_s21 = sld [smem:[#allocation2 + $0x303]]  ;;  %v729_v43 = vmax.f32 %v150_v27, 0.0 }
  0x56   :  { %v180_v61 = vmul.f32 %v593_v4, %v179_v58  ;;  %s675_s22 = sld [smem:[#allocation5 + $0x6]]  ;;  %v183_v3 = vstv %s648_s16  ;;  %v166_v18 = vadd.f32 %v165_v63, %v162_v62 }
  0x57   :  { %v177_v2 = vadd.f32 %v176_v57, %v173_v53  ;;  %s679_s23 = sld [smem:[#allocation2 + $0x380]]  ;;  %v184_v14 = vmul.f32 %v614_v15, %v183_v3  ;;  %v187_v34 = vstv %s652_s17 }
  0x58   :  { %v191_v8 = vstv %s656_s19  ;;  %s683_s24 = sld [smem:[#allocation2 + $0x381]]  ;;  %v169_v33 = vadd.f32 %v168_v22, %v166_v18 }
  0x59   :  { %v192_v11 = vmul.f32 %v191_v8, %v577_v0  ;;  %v194_v12 = vstv %s661_s13  ;;  %s688_s18 = sld [smem:[#allocation2 + $0x382]]  ;;  %v181_v13 = vadd.f32 %v180_v61, %v177_v2 }
  0x5a   :  { %v195_v16 = vmul.f32 %v582_v1, %v194_v12  ;;  %v198_v17 = vstv %s666_s20  ;;  %s693_s25 = sld [smem:[#allocation2 + $0x383]] }
  0x5b   :  { %v199_v19 = vmul.f32 %v593_v4, %v198_v17  ;;  %v202_v20 = vstv %s671_s21  ;;  %s697_s26 = sld [smem:[#allocation5 + $0x7]]  ;;  %v185_v29 = vadd.f32 %v184_v14, %v181_v13 }
  0x5c   :  { %v196_v23 = vadd.f32 %v195_v16, %v192_v11  ;;  %v203_v24 = vmul.f32 %v614_v15, %v202_v20  ;;  %s701_s2 = sld [smem:[#allocation7]]  ;;  %v206_v41 = vstv %s675_s22 }
  0x5d   :  { %v210_v28 = vstv %s679_s23  ;;  %s706_s1 = sld [smem:[#allocation7 + $0x1]]  ;;  %v188_v44 = vadd.f32 %v187_v34, %v185_v29 }
  0x5e   :  { %v200_v30 = vadd.f32 %v199_v19, %v196_v23  ;;  %v211_v31 = vmul.f32 %v210_v28, %v577_v0  ;;  %v213_v32 = vstv %s683_s24  ;;  %s710_s27 = sld [smem:[#allocation7 + $0x2]]  ;;  %v723_v0 = vmax.f32 %v131_v26, 0.0 }
  0x5f   :  { %v214_v35 = vmul.f32 %v582_v1, %v213_v32  ;;  %v217_v36 = vstv %s688_s18  ;;  %s715_s28 = sld [smem:[#allocation7 + $0x3]]  ;;  %v747_v55 = vmax.f32 %v188_v44, 0.0  ;;  %s507_s18 = smov [#allocation10]  }
  0x60   :  { %v204_v38 = vadd.f32 %v203_v24, %v200_v30  ;;  %v218_v39 = vmul.f32 %v593_v4, %v217_v36  ;;  %v221_v40 = vstv %s693_s25  ;;  %s721_s29 = sld [smem:[#allocation7 + $0x4]]  ;;  %v734_v4 = vmax.f32 %v169_v33, 0.0  ;;  %s340_s25 = sshll.u32 %s507_s18, 4  ;;  %s341_s25 = int_to_ptr.vmem [resolvable:$true] %s340_s25 }
  0x61   :  { %v215_v42 = vadd.f32 %v214_v35, %v211_v31  ;;  %v222_v1 = vmul.f32 %v614_v15, %v221_v40  ;;  %s727_s30 = sld [smem:[#allocation7 + $0x5]]  ;;  %v225_v49 = vstv %s697_s26  ;;  %s475_s26 = scalar_lea.vmem %s341_s25, 48 }
  0x62   :  { %v229_v45 = vstv %s701_s2  ;;  %s732_s6 = sld [smem:[#allocation7 + $0x6]]  ;;  %v207_v15 = vadd.f32 %v206_v41, %v204_v38  ;;  %p476_p6 = scmp.ne.s32.totalorder %s341_s25, %s475_s26 }
  0x63   :  { %v219_v46 = vadd.f32 %v218_v39, %v215_v42  ;;  %v230_v47 = vmul.f32 %v229_v45, %v703_v25  ;;  %v232_v48 = vstv %s706_s1  ;;  %s738_s7 = sld [smem:[#allocation7 + $0x7]]  ;;  %s479_s2 = scalar_lea.vmem %s341_s25, 64 }
  0x64   :  { %v233_v50 = vmul.f32 %v232_v48, %v717_v37  ;;  %v236_v51 = vstv %s710_s27  ;;  %s743_s8 = sld [smem:[#allocation8]]  ;;  %v752_v61 = vmax.f32 %v207_v15, 0.0  ;;  %p480_p7 = scmp.lt.s32.totalorder %s341_s25, %s341_s25 }
  0x65   :  { %v223_v52 = vadd.f32 %v222_v1, %v219_v46  ;;  %v237_v53 = vmul.f32 %v236_v51, %v723_v0  ;;  %v240_v54 = vstv %s715_s28  ;;  %s402_s9 = sld [smem:[#allocation7 + $0x80]]  ;;  %p481_p8 = scmp.lt.s32.totalorder %s479_s2, %s475_s26 }
  0x66   :  { %v234_v56 = vadd.f32 %v233_v50, %v230_v47  ;;  %v241_v57 = vmul.f32 %v240_v54, %v729_v43  ;;  %v244_v58 = vstv %s721_s29  ;;  %s403_s3 = sld [smem:[#allocation7 + $0x81]] }
  0x67   :  { %v226_v59 = vadd.f32 %v225_v49, %v223_v52  ;;  %v248_v60 = vstv %s727_s30  ;;  %s404_s4 = sld [smem:[#allocation7 + $0x82]]  ;;  %v245_v63 = vmul.f32 %v244_v58, %v734_v4  ;;  %p482_p9 = por %p481_p8, %p480_p7 }
  0x68   :  { %v238_v62 = vadd.f32 %v237_v53, %v234_v56  ;;  %s405_s10 = sld [smem:[#allocation7 + $0x83]]  ;;  %v252_v2 = vstv %s732_s6  ;;  %v249_v6 = vmul.f32 %v248_v60, %v747_v55 }
  0x69   :  { %s406_s11 = sld [smem:[#allocation7 + $0x84]]  ;;  %v756_v3 = vmax.f32 %v226_v59, 0.0  ;;  %v256_v7 = vstv %s738_s7  ;;  %v253_v10 = vmul.f32 %v252_v2, %v752_v61  ;;  %p483_p10 = pnand %p482_p9, %p476_p6 }
  0x6a   :  { %v242_v5 = vadd.f32 %v241_v57, %v238_v62  ;;  %s759_s0 = sld [smem:[#allocation7 + $0x85]]  ;;  %v260_v26 = vstv %s743_s8 }
  0x6b   :  { %v264_v8 = vstv %s402_s9  ;;  %s762_s12 = sld [smem:[#allocation7 + $0x86]]  ;;  %v257_v17 = vmul.f32 %v256_v7, %v756_v3 }
  0x6c   :  { %v246_v9 = vadd.f32 %v245_v63, %v242_v5  ;;  %v265_v11 = vmul.f32 %v264_v8, %v703_v25  ;;  %v267_v12 = vstv %s403_s3  ;;  %s766_s14 = sld [smem:[#allocation7 + $0x87]] }
  0x6d   :  { %v268_v13 = vmul.f32 %v267_v12, %v717_v37  ;;  %v271_v14 = vstv %s404_s4  ;;  %s769_s15 = sld [smem:[#allocation8 + $0x1]] }
  0x6e   :  { %v250_v16 = vadd.f32 %v249_v6, %v246_v9  ;;  %v272_v18 = vmul.f32 %v271_v14, %v723_v0  ;;  %v275_v19 = vstv %s405_s10  ;;  %s411_s16 = sld [smem:[#allocation7 + $0x100]] }
  0x6f   :  { %v269_v20 = vadd.f32 %v268_v13, %v265_v11  ;;  %v276_v21 = vmul.f32 %v275_v19, %v729_v43  ;;  %v279_v22 = vstv %s406_s11  ;;  %s412_s17 = sld [smem:[#allocation7 + $0x101]] }
  0x70   :  { %v254_v23 = vadd.f32 %v253_v10, %v250_v16  ;;  %v283_v24 = vstv %s759_s0  ;;  %s413_s19 = sld [smem:[#allocation7 + $0x102]]  ;;  %v280_v28 = vmul.f32 %v279_v22, %v734_v4 }
  0x71   :  { %v273_v27 = vadd.f32 %v272_v18, %v269_v20  ;;  %s414_s13 = sld [smem:[#allocation7 + $0x103]]  ;;  %v287_v30 = vstv %s762_s12  ;;  %v284_v32 = vmul.f32 %v283_v24, %v747_v55 }
  0x72   :  { %v258_v29 = vadd.f32 %v257_v17, %v254_v23  ;;  %s415_s20 = sld [smem:[#allocation7 + $0x104]]  ;;  %v291_v34 = vstv %s766_s14  ;;  %v288_v38 = vmul.f32 %v287_v30, %v752_v61 }
  0x73   :  { %v277_v31 = vadd.f32 %v276_v21, %v273_v27  ;;  %s416_s21 = sld [smem:[#allocation7 + $0x105]]  ;;  %v292_v44 = vmul.f32 %v291_v34, %v756_v3  ;;  %v295_v51 = vstv %s769_s15 }
  0x74   :  { %v261_v33 = vadd.f32 %v260_v26, %v258_v29  ;;  %v300_v35 = vstv %s411_s16  ;;  %s417_s22 = sld [smem:[#allocation7 + $0x106]] }
  0x75   :  { %v281_v36 = vadd.f32 %v280_v28, %v277_v31  ;;  %v301_v39 = vmul.f32 %v300_v35, %v703_v25  ;;  %v303_v40 = vstv %s412_s17  ;;  %s418_s23 = sld [smem:[#allocation7 + $0x107]] }
  0x76   :  { %262 = vst [vmem:[#allocation10] sm:$0x1] %v261_v33  ;;  %v304_v41 = vmul.f32 %v303_v40, %v717_v37  ;;  %v307_v42 = vstv %s413_s19  ;;  %s419_s24 = sld [smem:[#allocation8 + $0x2]] }
  0x77   :  { %v285_v1 = vadd.f32 %v284_v32, %v281_v36  ;;  %v308_v45 = vmul.f32 %v307_v42, %v723_v0  ;;  %v311_v46 = vstv %s414_s13 }
  0x78   :  { %v305_v47 = vadd.f32 %v304_v41, %v301_v39  ;;  %v312_v48 = vmul.f32 %v311_v46, %v729_v43  ;;  %v315_v15 = vstv %s415_s20 }
  0x79   :  { %v289_v49 = vadd.f32 %v288_v38, %v285_v1  ;;  %v319_v50 = vstv %s416_s21  ;;  %v316_v52 = vmul.f32 %v315_v15, %v734_v4 }
  0x7a   :  { %v309_v25 = vadd.f32 %v308_v45, %v305_v47  ;;  %v323_v54 = vstv %s417_s22  ;;  %v320_v56 = vmul.f32 %v319_v50, %v747_v55 }
  0x7b   :  { %v293_v53 = vadd.f32 %v292_v44, %v289_v49  ;;  %v327_v58 = vstv %s418_s23  ;;  %v324_v59 = vmul.f32 %v323_v54, %v752_v61 }
  0x7c   :  { %v313_v37 = vadd.f32 %v312_v48, %v309_v25  ;;  %v328_v60 = vmul.f32 %v327_v58, %v756_v3  ;;  %v331_v63 = vstv %s419_s24 }
  0x7d   :  { %v296_v57 = vadd.f32 %v295_v51, %v293_v53 }
  0x7e   :  { %v317_v0 = vadd.f32 %v316_v52, %v313_v37 }
  0x7f   :  { %298 = vst [vmem:[#allocation10 + $0x1] sm:$0x1] %v296_v57 }
  0x80   :  { %v321_v43 = vadd.f32 %v320_v56, %v317_v0 }
  0x82   :  { %v325_v62 = vadd.f32 %v324_v59, %v321_v43 }
  0x84   :  { %v329_v4 = vadd.f32 %v328_v60, %v325_v62 }
  0x86   :  { %v332_v2 = vadd.f32 %v331_v63, %v329_v4 }
  0x88   :  { %334 = vst [vmem:[#allocation10 + $0x2] sm:$0x1] %v332_v2 }
  0x89   :  { %486 = shalt.err (!%p483_p10)
}
  0x8a   :  { %s508_s1 = smov 16   ;;  %s509_s27 = smov 1  }
  0x8b   :  { %346 = dma.vmem_to_hbm [thread:$0]  %s341_s25, 48, %s799_s5, [#allocation3], %s508_s1, %s508_s1, %s509_s27  }
  0x8c   :  { %501 = dma.done.wait [#allocation3], 48  }
  0x8d   :  { %502 = vsyncadd [#allocation3], 4294967248 }
  0x8e   :  { %350 = vsyncpa [#allocation3], 1 }
  0x8f   :  { %351 = vsyncpa [#allocation4], 1 }
  0x90   :  { %352 = vsyncpa [#allocation6], 1 }
  0x91   :  { %353 = vsyncpa [#allocation9], 1 }

</bundles_post_ra>
